<compile_context>
chip_gen: v5e
topology: v5e:2x2
jax: 0.10.0
libtpu: 0.0.40
codegen_flags: <defaults>
</compile_context>

<pallas_src>
from functools import partial

import numpy as np
import jax
import jax.numpy as jnp
from jax.experimental import pallas as pl
from jax.experimental.pallas import tpu as pltpu


def _round_up(x, m):
    return ((x + m - 1) // m) * m


def _feature_tiles(in_features, out_features, tile_k, tile_n):
    """Effective (lane-aligned) K/N tile sizes and padded extents."""
    tk = min(max(128, _round_up(tile_k, 128)), _round_up(in_features, 128))
    tn = min(max(128, _round_up(tile_n, 128)), _round_up(out_features, 128))
    k_pad = _round_up(in_features, tk)
    n_pad = _round_up(out_features, tn)
    return tk, tn, k_pad, n_pad


def _linear_kernel(x_ref, w_ref, b_ref, o_ref, acc_ref):
    """One (tile_m, tile_n) output tile; K is the innermost (reduction) axis."""
    @pl.when(pl.program_id(2) == 0)
    def _init():
        acc_ref[...] = jnp.zeros_like(acc_ref)

    acc_ref[...] += jnp.dot(x_ref[...], w_ref[...],
                            preferred_element_type=jnp.float32)

    @pl.when(pl.program_id(2) == pl.num_programs(2) - 1)
    def _finish():
        o_ref[...] = (acc_ref[...] + b_ref[...].astype(jnp.float32)
                      ).astype(o_ref.dtype)


def prepare_linear_params(weight, bias, *, tile_n=256, tile_k=512,
                          param_dtype=None):
    """One-time weight prep: transpose to (K, N), pad to tile multiples.

    Do this once at init (not per forward call).  `param_dtype=jnp.bfloat16`
    gives the MXU-native fast path on v6e / v7x.
    """
    out_features, in_features = weight.shape
    _, _, k_pad, n_pad = _feature_tiles(in_features, out_features, tile_k, tile_n)

    w = weight.T                      # (K, N)
    b = bias.reshape(1, -1)           # (1, N)
    if param_dtype is not None:
        w = w.astype(param_dtype)
        b = b.astype(param_dtype)
    if w.shape != (k_pad, n_pad):
        w = jnp.pad(w, ((0, k_pad - in_features), (0, n_pad - out_features)))
    if b.shape[1] != n_pad:
        b = jnp.pad(b, ((0, 0), (0, n_pad - out_features)))
    return w, b


@partial(jax.jit,
         static_argnames=("in_features", "out_features",
                          "tile_m", "tile_n", "tile_k"))
def linear_forward_prepared(x, w_p, b_p, *, in_features, out_features,
                            tile_m=256, tile_n=256, tile_k=512):
    """out = x.view(-1, in_features) @ W.T + b with pre-prepared (w_p, b_p).

    Defaults (tile_m=256, tile_n=256, tile_k=512) keep the f32 working set
    ~3 MiB, well under the default scoped VMEM on v5e/v6e/v7x; shrink tile_m/
    tile_k further for very large K on v5e, or leave as-is on v6e/v7x.
    """
    x2d = x.reshape(-1, in_features)
    m = x2d.shape[0]

    tk, tn, k_pad, n_pad = _feature_tiles(in_features, out_features,
                                          tile_k, tile_n)
    if w_p.shape != (k_pad, n_pad) or b_p.shape != (1, n_pad):
        raise ValueError("prepared params do not match the tiling; call "
                         "prepare_linear_params with the same tile_k/tile_n")

    # Pad K only if needed (zeros are required: K contaminates real outputs).
    if k_pad != in_features:
        x2d = jnp.pad(x2d, ((0, 0), (0, k_pad - in_features)))
    # M is never padded: the ragged last row-block is handled by Pallas and
    # sliced off / write-masked (rows are independent, so garbage rows in the
    # padded part of the block never touch valid outputs).
    tm = min(max(8, _round_up(tile_m, 8)), _round_up(m, 8))

    grid = (pl.cdiv(m, tm), n_pad // tn, k_pad // tk)
    out_dtype = x2d.dtype

    itemsize = lambda a: jnp.dtype(a.dtype).itemsize
    cost = pl.CostEstimate(
        flops=2 * m * k_pad * n_pad,
        bytes_accessed=(x2d.size * itemsize(x2d)
                        + w_p.size * itemsize(w_p)
                        + b_p.size * itemsize(b_p)
                        + m * n_pad * jnp.dtype(out_dtype).itemsize),
        transcendentals=0,
    )

    out = pl.pallas_call(
        _linear_kernel,
        out_shape=jax.ShapeDtypeStruct((m, n_pad), out_dtype),
        grid_spec=pltpu.PrefetchScalarGridSpec(
            num_scalar_prefetch=0,
            grid=grid,
            in_specs=[
                pl.BlockSpec((tm, tk), lambda i, j, k: (i, k)),   # x row/K tile
                pl.BlockSpec((tk, tn), lambda i, j, k: (k, j)),   # weight tile
                pl.BlockSpec((1, tn), lambda i, j, k: (0, j)),    # bias tile
            ],
            out_specs=pl.BlockSpec((tm, tn), lambda i, j, k: (i, j)),
            scratch_shapes=[pltpu.VMEM((tm, tn), jnp.float32)],   # f32 acc
        ),
        compiler_params=pltpu.CompilerParams(
            dimension_semantics=("parallel", "parallel", "arbitrary")),
        cost_estimate=cost,
    )(x2d, w_p, b_p)

    return out[:, :out_features]


def linear_forward(x, weight, bias, *, tile_m=256, tile_n=256, tile_k=512,
                   param_dtype=None):
    """Convenience one-shot path (prep + forward).  Prefer caching the prep."""
    out_features, in_features = weight.shape
    w_p, b_p = prepare_linear_params(weight, bias, tile_n=tile_n,
                                     tile_k=tile_k, param_dtype=param_dtype)
    return linear_forward_prepared(x, w_p, b_p,
                                   in_features=in_features,
                                   out_features=out_features,
                                   tile_m=tile_m, tile_n=tile_n, tile_k=tile_k)


if __name__ == "__main__":
    key = jax.random.PRNGKey(0)
    wkey, bkey, xkey = jax.random.split(key, 3)

    # Small shapes consistent with the module: x flattens to input_size.
    batch, channels, height, width = 2, 4, 16, 16
    input_size = channels * height * width      # 1024
    output_size = 32

    # PyTorch-style uniform fan-in init for nn.Linear.
    bound = 1.0 / float(np.sqrt(input_size))
    weight = jax.random.uniform(wkey, (output_size, input_size),
                                jnp.float32, -bound, bound)
    bias = jax.random.uniform(bkey, (output_size,), jnp.float32, -bound, bound)
    x = jax.random.normal(xkey, (batch, channels, height, width), jnp.float32)

    # --- f32 (native dtype) path: weight prep hoisted out of the call path.
    w_p, b_p = prepare_linear_params(weight, bias)
    out = jax.block_until_ready(
        linear_forward_prepared(x, w_p, b_p,
                                in_features=input_size,
                                out_features=output_size))
    assert out.shape == (batch, output_size)

    ref = x.reshape(-1, input_size) @ weight.T + bias
    np.testing.assert_allclose(np.asarray(out), np.asarray(ref),
                               rtol=2e-5, atol=2e-5)

    # --- bf16 fast path (MXU-native on v6e/v7x), f32 accumulation in-kernel.
    w_bf, b_bf = prepare_linear_params(weight, bias, param_dtype=jnp.bfloat16)
    out_bf = jax.block_until_ready(
        linear_forward_prepared(x.astype(jnp.bfloat16), w_bf, b_bf,
                                in_features=input_size,
                                out_features=output_size))
    np.testing.assert_allclose(np.asarray(out_bf, dtype=np.float32),
                               np.asarray(ref), rtol=6e-2, atol=6e-2)

    print("KERNEL_OK")
</pallas_src>

<mosaic_0001>
module attributes {stable_mosaic.version = 11 : i64} {
  func.func @_linear_kernel(%arg0: i32, %arg1: i32, %arg2: i32, %arg3: memref<8x512xf32, #tpu.memory_space<vmem>>, %arg4: memref<512x128xf32, #tpu.memory_space<vmem>>, %arg5: memref<1x128xf32, #tpu.memory_space<vmem>>, %arg6: memref<8x128xf32, #tpu.memory_space<vmem>>, %arg7: memref<8x128xf32, #tpu.memory_space<vmem>>) attributes {dimension_semantics = [#tpu.dimension_semantics<parallel>, #tpu.dimension_semantics<parallel>, #tpu.dimension_semantics<arbitrary>], iteration_bounds = array<i64: 1, 1, 2>, scalar_prefetch = 0 : i64, scratch_operands = 1 : i64, tpu.core_type = #tpu.core_type<tc>, window_params = [{transform_indices = @transform_0, window_bounds = array<i64: 8, 512>}, {transform_indices = @transform_1, window_bounds = array<i64: 512, 128>}, {transform_indices = @transform_2, window_bounds = array<i64: 1, 128>}, {transform_indices = @transform_3, window_bounds = array<i64: 8, 128>}]} {
    %c0_i32 = arith.constant 0 : i32
    %0 = arith.cmpi eq, %arg2, %c0_i32 : i32
    %1 = arith.extui %0 : i1 to i32
    %c0_i32_0 = arith.constant 0 : i32
    %2 = arith.cmpi ne, %1, %c0_i32_0 : i32
    scf.if %2 {
      %cst_9 = arith.constant 0.000000e+00 : f32
      %12 = vector.broadcast %cst_9 : f32 to vector<8x128xf32>
      %c0_10 = arith.constant 0 : index
      %c0_11 = arith.constant 0 : index
      %13 = vector.load %arg7[%c0_10, %c0_11] : memref<8x128xf32, #tpu.memory_space<vmem>>, vector<8x128xf32>
      tpu.vector_store %arg7[%c0_10, %c0_11], %12 {strides = array<i32>} : memref<8x128xf32, #tpu.memory_space<vmem>>, vector<8x128xf32>,
    } else {
    }
    %c0 = arith.constant 0 : index
    %c0_1 = arith.constant 0 : index
    %3 = vector.load %arg7[%c0, %c0_1] : memref<8x128xf32, #tpu.memory_space<vmem>>, vector<8x128xf32>
    %c0_2 = arith.constant 0 : index
    %c0_3 = arith.constant 0 : index
    %4 = vector.load %arg3[%c0_2, %c0_3] : memref<8x512xf32, #tpu.memory_space<vmem>>, vector<8x512xf32>
    %c0_4 = arith.constant 0 : index
    %c0_5 = arith.constant 0 : index
    %5 = vector.load %arg4[%c0_4, %c0_5] : memref<512x128xf32, #tpu.memory_space<vmem>>, vector<512x128xf32>
    %cst = arith.constant dense<0.000000e+00> : vector<8x128xf32>
    %6 = tpu.matmul %4, %5, %cst {dimension_numbers = #tpu.dot_dimension_numbers<[1], [0], [0], [1], [0, 0, 1, 1], [], []>} : vector<8x512xf32>, vector<512x128xf32>, vector<8x128xf32> -> vector<8x128xf32>
    %7 = arith.addf %3, %6 : vector<8x128xf32>
    %c0_6 = arith.constant 0 : index
    %c0_7 = arith.constant 0 : index
    %8 = vector.load %arg7[%c0_6, %c0_7] : memref<8x128xf32, #tpu.memory_space<vmem>>, vector<8x128xf32>
    tpu.vector_store %arg7[%c0_6, %c0_7], %7 {strides = array<i32>} : memref<8x128xf32, #tpu.memory_space<vmem>>, vector<8x128xf32>,
    %c1_i32 = arith.constant 1 : i32
    %9 = arith.cmpi eq, %arg2, %c1_i32 : i32
    %10 = arith.extui %9 : i1 to i32
    %c0_i32_8 = arith.constant 0 : i32
    %11 = arith.cmpi ne, %10, %c0_i32_8 : i32
    scf.if %11 {
      %c0_9 = arith.constant 0 : index
      %c0_10 = arith.constant 0 : index
      %12 = vector.load %arg7[%c0_9, %c0_10] : memref<8x128xf32, #tpu.memory_space<vmem>>, vector<8x128xf32>
      %c0_11 = arith.constant 0 : index
      %c0_12 = arith.constant 0 : index
      %13 = vector.load %arg5[%c0_11, %c0_12] : memref<1x128xf32, #tpu.memory_space<vmem>>, vector<1x128xf32>
      %14 = vector.broadcast %13 : vector<1x128xf32> to vector<8x128xf32>
      %15 = arith.addf %12, %14 : vector<8x128xf32>
      %c0_13 = arith.constant 0 : index
      %c0_14 = arith.constant 0 : index
      %16 = vector.load %arg6[%c0_13, %c0_14] : memref<8x128xf32, #tpu.memory_space<vmem>>, vector<8x128xf32>
      tpu.vector_store %arg6[%c0_13, %c0_14], %15 {strides = array<i32>} : memref<8x128xf32, #tpu.memory_space<vmem>>, vector<8x128xf32>,
    } else {
    }
    return
  }
  func.func @transform_0(%arg0: i32, %arg1: i32, %arg2: i32) -> (i32, i32) {
    %c0_i32 = arith.constant 0 : i32
    return %arg0, %arg2 : i32, i32
  }
  func.func @transform_1(%arg0: i32, %arg1: i32, %arg2: i32) -> (i32, i32) {
    %c0_i32 = arith.constant 0 : i32
    return %arg2, %arg1 : i32, i32
  }
  func.func @transform_2(%arg0: i32, %arg1: i32, %arg2: i32) -> (i32, i32) {
    %c0_i32 = arith.constant 0 : i32
    %c0_i32_0 = arith.constant 0 : i32
    return %c0_i32, %arg1 : i32, i32
  }
  func.func @transform_3(%arg0: i32, %arg1: i32, %arg2: i32) -> (i32, i32) {
    %c0_i32 = arith.constant 0 : i32
    return %arg0, %arg1 : i32, i32
  }
}

</mosaic_0001>

<bundles_post_ra>
// kernel: linear_forward_prepared.1
= control target key start
LH: loop header
LB: loop body
LE: loop exit
PB: predicated region body
PF: predicated region fallthrough
CT: control target
= control target key end

     0   :  { %8 = vsyncpa [#allocation5], 0  ;;  %s1082_s0 = inlined_call_operand.vmem [shape: f32[2,1024], index: 0, kind: input, shape index: {}]   ;;  %s1083_s1 = inlined_call_operand.hbm [shape: f32[1024,128], index: 1, kind: input, shape index: {}]   ;;  %s1084_s2 = inlined_call_operand.vmem [shape: f32[1,128], index: 2, kind: input, shape index: {}]   ;;  %s1085_s3 = inlined_call_operand.hbm [shape: f32[2,128], index: 3, kind: output, shape index: {}]  }
   0x1   :  { %10 = vsyncpa [#allocation5 + $0x1], 0 }
   0x2   :  { %11 = vsyncpa [#allocation6], 0  ;;  %s907_s12 = smov 0   ;;  %s909_s13 = smov 0  }
   0x3   :  { %s911_s14 = smov 0   ;;  %s913_s15 = smov 0  }
   0x4   :  { %s915_s16 = smov 0   ;;  %s917_s17 = smov 0  }
   0x5 LB: > { %s936_s18 = sadd.s32 4294967295, %s875_s17   ;;  %s29_s19 = sadd.s32 1, %s871_s16  ;;  %s875_s17 = sphi %s917_s17, %s17_s17   ;;  %s871_s16 = sphi %s915_s16, %s1092_s16   ;;  %s867_s15 = sphi %s913_s15, %s1091_s15   ;;  %s863_s14 = sphi %s911_s14, %s1090_s14   ;;  %s859_s13 = sphi %s909_s13, %s1089_s13   ;;  %s855_s12 = sphi %s907_s12, %s1088_s12  }
   0x6   : > { %p30_p0 = scmp.ge.s32.totalorder %s29_s19, 2  ;;  %s45_s20 = sadd.s32 1, %s863_s14 }
   0x7   : > { %p52_p1 = scmp.ne.s32.totalorder %s863_s14, %s859_s13  ;;  %p53_p2 = scmp.eq.s32.totalorder %s875_s17, 0 }
   0x8   : > { %s1094_s19 = smov (%p30_p0, %s29_s19), 0  ;;  %p86_p4 = scmp.ne.s32.totalorder %s859_s13, %s855_s12 }
   0x9   : > { %p945_p3 = por %p53_p2, %p52_p1  ;;  %s41_s22 = ssub.s32 %s871_s16, %s1094_s19 }
   0xa   : > { %p87_p5 = scmp.eq.s32.totalorder %s936_s18, 0  ;;  %p43_p6 = scmp.eq.s32.totalorder %s41_s22, 0 }
   0xb   : > { %p641_p8 = scmp.ge.s32.totalorder %s875_s17, 2 }
   0xc   : > { %p953_p7 = por %p87_p5, %p86_p4 }
   0xd   : > { %s958_s24 = scalar_select %p43_p6, %s863_s14, %s45_s20  }
   0xe   : > { %166 = sbr.rel (%p641_p8) target bundleno = 38 (0x26), region = 20 }
  0x13   : > { %169 = sbr.rel (!%p945_p3) target bundleno = 32 (0x20), region = 24  ;;  %s171_s25 = sand.u32 (%p945_p3), 1, %s863_s14  }
  0x14   : > { %s659_s26 = sshll.u32 (%p945_p3), %s871_s16, 3  ;;  %s642_s27 = sshll.u32 (%p945_p3), %s171_s25, 5 }
  0x15   : > { %s183_s30 = scalar_lea.vmem (%p945_p3), %s1082_s0, %s659_s26   ;;  %s173_s4 = scalar_lea.vmem (%p945_p3), [#allocation3], %s642_s27  }
  0x16   : > { %s877_s5 = smov (%p945_p3), 0  }
  0x18 LB: >> { %v222_v0 = vld [vmem:[%s183_s30] sm:$0xff]  ;;  %s216_s5 = sadd.s32 1, %s879_s5   ;;  %s879_s5 = sphi %s877_s5, %s216_s5  }
  0x19   : >> { %223 = vst [vmem:[%s173_s4] sm:$0xff] %v222_v0  ;;  %p215_p9 = scmp.ge.s32.totalorder %s216_s5, 1 }
  0x1b   : > { %218 = sbr.rel (!%p215_p9) target bundleno = 24 (0x18), region = 130 }
  0x20 PF: > { %s237_s6 = sand.u32 1, %s863_s14   ;;  %s660_s7 = sshll.u32 %s871_s16, 9 }
  0x21   : > { %s647_s8 = sshll.u32 %s237_s6, 9  ;;  %s247_s11 = scalar_lea.hbm %s1083_s1, %s660_s7 }
  0x22   : > { %s248_s12 = sshll.u32 %s247_s11, 4  ;;  %s241_s20 = scalar_lea.vmem [#allocation4], %s647_s8  ;;  %s249_s12 = int_to_ptr.hbm [resolvable:$true] %s248_s12 }
  0x23   : > { %s250_s22 = sshll.u32 %s241_s20, 4  ;;  %s238_s25 = scalar_lea.sflag [#allocation5], %s237_s6  ;;  %s251_s22 = int_to_ptr.vmem [resolvable:$true] %s250_s22 }
  0x24   : > { %s881_s26 = smov 128   ;;  %s882_s27 = smov 8  }
  0x25   : > { %661 = dma.hbm_to_vmem [thread:$0]  (%p945_p3), %s249_s12, 8192, %s251_s22, %s238_s25, %s881_s26, %s881_s26, %s882_s27  }
  0x26 PF: > { %p650_p10 = scmp.ge.s32.totalorder %s875_s17, 1  ;;  %p258_p11 = scmp.lt.s32.totalorder %s875_s17, 3 }
  0x28   : > { %p259_p12 = pnand %p650_p10, %p258_p11 }
  0x29   : > { %s265_s28 = sand.u32 (!%p259_p12), 1, %s859_s13  }
  0x2a   : > { %262 = sbr.rel (%p259_p12) target bundleno = 254 (0xfe), region = 66  ;;  %s651_s29 = sshll.u32 (!%p259_p12), %s265_s28, 5 }
  0x2b   : > { %s652_s30 = sshll.u32 (!%p259_p12), %s265_s28, 9  ;;  %s978_s4 = scalar_lea.vmem (!%p259_p12), [#allocation3], %s651_s29 }
  0x2c   : > { %s272_s5 = scalar_lea.sflag (!%p259_p12), [#allocation5], %s265_s28  ;;  %s980_s6 = scalar_lea.vmem (!%p259_p12), [#allocation4], %s652_s30 }
  0x2f   : > { %846 = dma.done.wait (%p953_p7), %s272_s5, 8192  }
  0x30   : > { %848 = vsyncadd (%p953_p7), %s272_s5, 4294959104  ;;  %p653_p13 = scmp.ne.s32.totalorder %s867_s15, 0 }
  0x32   : > { %316 = sbr.rel (%p653_p13) target bundleno = 57 (0x39), region = 78 }
  0x37   : > { %v883_v1 = vmov 0.0  }
  0x38   : > { %317 = vst [vmem:[#allocation2] sm:$0xff] %v883_v1 }
  0x39 PF: > { %v370_v2 = vld [vmem:[%s980_s6 + $0x178] sm:$0xff]  ;;  %v369_v3 = vld [vmem:[%s980_s6 + $0x170] sm:$0xff]  ;;  %v368_v7 = vld [vmem:[%s980_s6 + $0x168] sm:$0xff]  ;;  %p654_p0 = scmp.ne.s32.totalorder %s867_s15, 1 }
  0x3a   : > { %v386_v4 = vld [vmem:[%s980_s6 + $0x1f8] sm:$0xff]  ;;  %446 = vmatpush.msra.mxu2 %v370_v2  ;;  %v385_v8 = vld [vmem:[%s980_s6 + $0x1f0] sm:$0xff]  ;;  %v384_v11 = vld [vmem:[%s980_s6 + $0x1e8] sm:$0xff] }
  0x3b   : > { %466 = vmatpush.msra.mxu3 %v386_v4  ;;  %v338_v5 = vld [vmem:[%s980_s6 + $0x78] sm:$0xff]  ;;  %v337_v9 = vld [vmem:[%s980_s6 + $0x70] sm:$0xff]  ;;  %v336_v12 = vld [vmem:[%s980_s6 + $0x68] sm:$0xff] }
  0x3c   : > { %v354_v6 = vld [vmem:[%s980_s6 + $0xf8] sm:$0xff]  ;;  %406 = vmatpush.msra.mxu0 %v338_v5  ;;  %v353_v10 = vld [vmem:[%s980_s6 + $0xf0] sm:$0xff]  ;;  %447 = vmatpush.msra.mxu2 %v369_v3  ;;  %v367_v13 = vld [vmem:[%s980_s6 + $0x160] sm:$0xff] }
  0x3d   : > { %426 = vmatpush.msra.mxu1 %v354_v6  ;;  %467 = vmatpush.msra.mxu3 %v385_v8  ;;  %v352_v14 = vld [vmem:[%s980_s6 + $0xe8] sm:$0xff]  ;;  %v383_v15 = vld [vmem:[%s980_s6 + $0x1e0] sm:$0xff]  ;;  %v366_v18 = vld [vmem:[%s980_s6 + $0x158] sm:$0xff] }
  0x3e   : > { %407 = vmatpush.msra.mxu0 %v337_v9  ;;  %448 = vmatpush.msra.mxu2 %v368_v7  ;;  %v335_v16 = vld [vmem:[%s980_s6 + $0x60] sm:$0xff]  ;;  %v382_v19 = vld [vmem:[%s980_s6 + $0x1d8] sm:$0xff]  ;;  %v365_v22 = vld [vmem:[%s980_s6 + $0x150] sm:$0xff] }
  0x3f   : > { %427 = vmatpush.msra.mxu1 %v353_v10  ;;  %468 = vmatpush.msra.mxu3 %v384_v11  ;;  %v351_v17 = vld [vmem:[%s980_s6 + $0xe0] sm:$0xff]  ;;  %v334_v20 = vld [vmem:[%s980_s6 + $0x58] sm:$0xff]  ;;  %v381_v23 = vld [vmem:[%s980_s6 + $0x1d0] sm:$0xff] }
  0x40   : > { %408 = vmatpush.msra.mxu0 %v336_v12  ;;  %449 = vmatpush.msra.mxu2 %v367_v13  ;;  %v350_v21 = vld [vmem:[%s980_s6 + $0xd8] sm:$0xff]  ;;  %v333_v24 = vld [vmem:[%s980_s6 + $0x50] sm:$0xff]  ;;  %v364_v26 = vld [vmem:[%s980_s6 + $0x148] sm:$0xff] }
  0x41   : > { %428 = vmatpush.msra.mxu1 %v352_v14  ;;  %469 = vmatpush.msra.mxu3 %v383_v15  ;;  %v349_v25 = vld [vmem:[%s980_s6 + $0xd0] sm:$0xff]  ;;  %v380_v27 = vld [vmem:[%s980_s6 + $0x1c8] sm:$0xff]  ;;  %v363_v30 = vld [vmem:[%s980_s6 + $0x140] sm:$0xff] }
  0x42   : > { %409 = vmatpush.msra.mxu0 %v335_v16  ;;  %450 = vmatpush.msra.mxu2 %v366_v18  ;;  %v332_v28 = vld [vmem:[%s980_s6 + $0x48] sm:$0xff]  ;;  %v379_v31 = vld [vmem:[%s980_s6 + $0x1c0] sm:$0xff]  ;;  %v362_v34 = vld [vmem:[%s980_s6 + $0x138] sm:$0xff] }
  0x43   : > { %429 = vmatpush.msra.mxu1 %v351_v17  ;;  %470 = vmatpush.msra.mxu3 %v382_v19  ;;  %v348_v29 = vld [vmem:[%s980_s6 + $0xc8] sm:$0xff]  ;;  %v331_v32 = vld [vmem:[%s980_s6 + $0x40] sm:$0xff]  ;;  %v378_v35 = vld [vmem:[%s980_s6 + $0x1b8] sm:$0xff] }
  0x44   : > { %410 = vmatpush.msra.mxu0 %v334_v20  ;;  %451 = vmatpush.msra.mxu2 %v365_v22  ;;  %v347_v33 = vld [vmem:[%s980_s6 + $0xc0] sm:$0xff]  ;;  %v330_v36 = vld [vmem:[%s980_s6 + $0x38] sm:$0xff]  ;;  %v361_v38 = vld [vmem:[%s980_s6 + $0x130] sm:$0xff] }
  0x45   : > { %430 = vmatpush.msra.mxu1 %v350_v21  ;;  %471 = vmatpush.msra.mxu3 %v381_v23  ;;  %v346_v37 = vld [vmem:[%s980_s6 + $0xb8] sm:$0xff]  ;;  %v377_v39 = vld [vmem:[%s980_s6 + $0x1b0] sm:$0xff]  ;;  %v360_v40 = vld [vmem:[%s980_s6 + $0x128] sm:$0xff] }
  0x46   : > { %411 = vmatpush.msra.mxu0 %v333_v24  ;;  %452 = vmatpush.msra.mxu2 %v364_v26  ;;  %v329_v41 = vld [vmem:[%s980_s6 + $0x30] sm:$0xff]  ;;  %v359_v43 = vld [vmem:[%s980_s6 + $0x120] sm:$0xff]  ;;  %v376_v44 = vld [vmem:[%s980_s6 + $0x1a8] sm:$0xff] }
  0x47   : > { %431 = vmatpush.msra.mxu1 %v349_v25  ;;  %472 = vmatpush.msra.mxu3 %v380_v27  ;;  %v345_v42 = vld [vmem:[%s980_s6 + $0xb0] sm:$0xff]  ;;  %v328_v45 = vld [vmem:[%s980_s6 + $0x28] sm:$0xff]  ;;  %v375_v47 = vld [vmem:[%s980_s6 + $0x1a0] sm:$0xff] }
  0x48   : > { %412 = vmatpush.msra.mxu0 %v332_v28  ;;  %453 = vmatpush.msra.mxu2 %v363_v30  ;;  %v344_v46 = vld [vmem:[%s980_s6 + $0xa8] sm:$0xff]  ;;  %v319_v48 = vld [vmem:[%s978_s4] sm:$0xff]  ;;  %v321_v50 = vld [vmem:[%s978_s4 + $0x10] sm:$0xff] }
  0x49   : > { %432 = vmatpush.msra.mxu1 %v348_v29  ;;  %473 = vmatpush.msra.mxu3 %v379_v31  ;;  %v320_v49 = vld [vmem:[%s978_s4 + $0x8] sm:$0xff]  ;;  %v322_v51 = vld [vmem:[%s978_s4 + $0x18] sm:$0xff]  ;;  %391 = vst [vmem:[#allocation1] ss:$4 sm:$0xff] %v319_v48  ;;  %v327_v52 = vld [vmem:[%s980_s6 + $0x20] sm:$0xff] }
  0x4a   : > { %413 = vmatpush.msra.mxu0 %v331_v32  ;;  %454 = vmatpush.msra.mxu2 %v362_v34  ;;  %v343_v53 = vld [vmem:[%s980_s6 + $0xa0] sm:$0xff]  ;;  %393 = vst [vmem:[#allocation1 + $0x1] ss:$4 sm:$0xff] %v320_v49  ;;  %v358_v54 = vld [vmem:[%s980_s6 + $0x118] sm:$0xff]  ;;  %v357_v58 = vld [vmem:[%s980_s6 + $0x110] sm:$0xff] }
  0x4b   : > { %433 = vmatpush.msra.mxu1 %v347_v33  ;;  %474 = vmatpush.msra.mxu3 %v378_v35  ;;  %v374_v55 = vld [vmem:[%s980_s6 + $0x198] sm:$0xff]  ;;  %395 = vst [vmem:[#allocation1 + $0x2] ss:$4 sm:$0xff] %v321_v50  ;;  %v373_v59 = vld [vmem:[%s980_s6 + $0x190] sm:$0xff]  ;;  %v356_v62 = vld [vmem:[%s980_s6 + $0x108] sm:$0xff] }
  0x4c   : > { %414 = vmatpush.msra.mxu0 %v330_v36  ;;  %455 = vmatpush.msra.mxu2 %v361_v38  ;;  %v326_v56 = vld [vmem:[%s980_s6 + $0x18] sm:$0xff]  ;;  %397 = vst [vmem:[#allocation1 + $0x3] ss:$4 sm:$0xff] %v322_v51  ;;  %v325_v60 = vld [vmem:[%s980_s6 + $0x10] sm:$0xff]  ;;  %v372_v63 = vld [vmem:[%s980_s6 + $0x188] sm:$0xff] }
  0x4d   : > { %434 = vmatpush.msra.mxu1 %v346_v37  ;;  %475 = vmatpush.msra.mxu3 %v377_v39  ;;  %v342_v57 = vld [vmem:[%s980_s6 + $0x98] sm:$0xff]  ;;  %v341_v61 = vld [vmem:[%s980_s6 + $0x90] sm:$0xff]  ;;  %v324_v0 = vld [vmem:[%s980_s6 + $0x8] sm:$0xff] }
  0x4e   : > { %415 = vmatpush.msra.mxu0 %v329_v41  ;;  %456 = vmatpush.msra.mxu2 %v360_v40  ;;  %v340_v1 = vld [vmem:[%s980_s6 + $0x88] sm:$0xff]  ;;  %v355_v2 = vld [vmem:[%s980_s6 + $0x100] sm:$0xff]  ;;  %v318_v16 = vld [vmem:[#allocation2] sm:$0xff] }
  0x4f   : > { %435 = vmatpush.msra.mxu1 %v345_v42  ;;  %476 = vmatpush.msra.mxu3 %v376_v44  ;;  %v371_v3 = vld [vmem:[%s980_s6 + $0x180] sm:$0xff] }
  0x50   : > { %416 = vmatpush.msra.mxu0 %v328_v45  ;;  %457 = vmatpush.msra.mxu2 %v359_v43  ;;  %v323_v4 = vld [vmem:[%s980_s6] sm:$0xff] }
  0x51   : > { %436 = vmatpush.msra.mxu1 %v344_v46  ;;  %477 = vmatpush.msra.mxu3 %v375_v47  ;;  %v339_v5 = vld [vmem:[%s980_s6 + $0x80] sm:$0xff] }
  0x52   : > { %417 = vmatpush.msra.mxu0 %v327_v52  ;;  %458 = vmatpush.msra.mxu2 %v358_v54 }
  0x53   : > { %437 = vmatpush.msra.mxu1 %v343_v53  ;;  %478 = vmatpush.msra.mxu3 %v374_v55  ;;  %v400_v6 = vld.sshfl [vmem:[#allocation1 + $0x10] sm:$0xff pattern:$0x73625140]  ;;  %v401_v7 = vld.sshfl [vmem:[#allocation1 + $0x18] sm:$0xff pattern:$0x73625140] }
  0x54   : > { %418 = vmatpush.msra.mxu0 %v326_v56  ;;  %459 = vmatpush.msra.mxu2 %v357_v58  ;;  %v398_v8 = vld.sshfl [vmem:[#allocation1] sm:$0xff pattern:$0x73625140]  ;;  %v399_v9 = vld.sshfl [vmem:[#allocation1 + $0x8] sm:$0xff pattern:$0x73625140] }
  0x55   : > { %438 = vmatpush.msra.mxu1 %v342_v57  ;;  %479 = vmatpush.msra.mxu3 %v373_v59 }
  0x56   : > { %419 = vmatpush.msra.mxu0 %v325_v60  ;;  %460 = vmatpush.msra.mxu2 %v356_v62 }
  0x57   : > { %439 = vmatpush.msra.mxu1 %v341_v61  ;;  %480 = vmatpush.msra.mxu3 %v372_v63 }
  0x58   : > { %420 = vmatpush.msra.mxu0 %v324_v0  ;;  %461 = vmatpush.msra.mxu2 %v355_v2 }
  0x59   : > { %440 = vmatpush.msra.mxu1 %v340_v1  ;;  %481 = vmatpush.msra.mxu3 %v371_v3 }
  0x5a   : > { %462 = vmatmul.f32.vlgmr.msra.gmra.mxu2 %v400_v6  ;;  %482 = vmatmul.f32.vlgmr.msra.gmra.mxu3 %v401_v7 }
  0x5b   : > { %421 = vmatpush.msra.mxu0 %v323_v4  ;;  %441 = vmatpush.msra.mxu1 %v339_v5 }
  0x5c   : > { %422 = vmatmul.f32.vlgmr.msra.gmra.mxu0 %v398_v8  ;;  %442 = vmatmul.f32.vlgmr.msra.gmra.mxu1 %v399_v9 }
  0xd9   : > { %v423_v10 = vpop.f32.mrf.mxu0  ;;  %v443_v11 = vpop.f32.mrf.mxu1 }
  0xda   : > { %v444_v12 = vadd.f32 %v443_v11, %v423_v10 }
  0xdd   : > { %v463_v13 = vpop.f32.mrf.mxu2  ;;  %v483_v14 = vpop.f32.mrf.mxu3 }
  0xde   : > { %v464_v15 = vadd.f32 %v463_v13, %v444_v12 }
  0xe0   : > { %v484_v17 = vadd.f32 %v483_v14, %v464_v15  ;;  %491 = sbr.rel (%p654_p0) target bundleno = 239 (0xef), region = 82 }
  0xe2   : > { %v486_v18 = vadd.f32 %v484_v17, %v318_v16 }
  0xe4   : > { %487 = vst [vmem:[#allocation2] sm:$0xff] %v486_v18 }
  0xe5   : > { %v752_v20 = vld [vmem:[%s1084_s2] ss:$0 sm:$0xff] }
  0xeb   : > { %v492_v19 = vld [vmem:[#allocation2] sm:$0xff] }
  0xec   : > { %v497_v21 = vadd.f32 %v752_v20, %v492_v19 }
  0xee   : > { %498 = vst [vmem:[#allocation7] sm:$0xff] %v497_v21 }
  0xef PF: > { %p655_p1 = scmp.ne.s32.totalorder %s936_s18, 1 }
  0xf1   : > { %501 = sbr.rel (%p655_p1) target bundleno = 250 (0xfa), region = 86 }
  0xf6   : > { %507 = vsyncadd [#allocation6], 96  ;;  %s515_s9 = sshll.u32 %s1085_s3, 4  ;;  %s884_s10 = smov [#allocation7]   ;;  %s516_s9 = int_to_ptr.hbm [resolvable:$true] %s515_s9 }
  0xf7   : > { %s513_s11 = sshll.u32 %s884_s10, 4  ;;  %s885_s15 = smov 32   ;;  %s514_s11 = int_to_ptr.vmem [resolvable:$true] %s513_s11 }
  0xf8   : > { %s886_s12 = smov 2  }
  0xf9   : > { %521 = dma.vmem_to_hbm [thread:$0]  %s514_s11, 32, %s516_s9, [#allocation6], %s885_s15, %s885_s15, %s886_s12  }
  0xfa PF: > { %p665_p2 = scmp.eq.s32.totalorder %s936_s18, 1 }
  0xfc   : > { %850 = dma.done.wait (%p665_p2), [#allocation6], 128  }
  0xfd   : > { %852 = vsyncadd (%p665_p2), [#allocation6], 4294967168 }
  0xfe PF: > { %s17_s17 = sadd.s32 1, %s875_s17   ;;  %s1088_s12 = smov %s859_s13 }
  0xff   : > { %p14_p3 = scmp.ge.s32.totalorder %s17_s17, 4   ;;  %s1089_s13 = smov %s863_s14 }
 0x100   : > { %s1090_s14 = smov %s958_s24  ;;  %s1091_s15 = smov %s871_s16 }
 0x101   : > { %s1092_s16 = smov %s1094_s19  ;;  %16 = sbr.rel (!%p14_p3) target bundleno = 5 (0x5), region = 141 }
 0x106   :  { %532 = vsyncpa [#allocation5], 1 }
 0x107   :  { %534 = vsyncpa [#allocation5 + $0x1], 1 }
 0x108   :  { %535 = vsyncpa [#allocation6], 1 }
 0x109   :  { %537 = vsyncpa [#allocation6 + $0x1], 1 }

</bundles_post_ra>
